<compile_context>
chip_gen: v5e
topology: v5e:2x2
jax: 0.10.0
libtpu: 0.0.40
codegen_flags: <defaults>
</compile_context>

<pallas_src>
import numpy as np

import jax
import jax.numpy as jnp
from jax.experimental import pallas as pl
from jax.experimental.pallas import tpu as pltpu


LANE = 128


def _round_up(v, m):
    return ((v + m - 1) // m) * m


def _pad2(a, rows, cols):
    return jnp.pad(a, ((0, rows - a.shape[0]), (0, cols - a.shape[1])))


# ----------------------------------------------------------------------------- kernel
def gcn_kernel(tiles_ref, a_ref, a0_ref, xw1_ref, b1_ref, acc_ref):
    """One *visited* Â row tile per grid step.

    a_ref   (tm, n_pad)    bf16  Â rows of tile t = tiles_ref[i]
    a0_ref  (1, tm)        f32   Â[0, t*tm:(t+1)*tm]  (node-0 layer-2 weights)
    xw1_ref (n_pad, h_pad) bf16  X @ W1 (precomputed in XLA, resident)
    b1_ref  (1, h_pad)     f32
    acc_ref (1, h_pad)     f32   output accumulator: sum_t Â[0,t] @ relu(Â_t XW1 + b1)
    """
    i = pl.program_id(0)

    @pl.when(i == 0)
    def _():
        acc_ref[...] = jnp.zeros_like(acc_ref)

    # --- layer 1 on this row tile (bf16 MXU, f32 accumulation): relu(Â_t (X W1) + b1)
    h = jnp.dot(a_ref[...], xw1_ref[...], preferred_element_type=jnp.float32)
    h = jnp.maximum(h + b1_ref[...], 0.0)
    # TODO(synk): training-mode dropout (p=0.5 via pltpu.prng_*) omitted — eval identity.

    # --- layer-2 aggregation, node 0 only (f32 for accuracy on the short contraction)
    acc_ref[...] += jnp.dot(a0_ref[...], h, preferred_element_type=jnp.float32)


# ----------------------------------------------------------------------------- glue
def normalized_adjacency(edge_index, num_nodes):
    """Dense Â = D^{-1/2}(A + I_remaining)D^{-1/2}, Â[dst, src], matching PyG
    gcn_norm (self loops added only for nodes that do not already have one)."""
    src = edge_index[0]
    dst = edge_index[1]
    A = jnp.zeros((num_nodes, num_nodes), dtype=jnp.float32)
    A = A.at[dst, src].add(1.0)
    diag = jnp.diagonal(A)
    A = A + jnp.diag(jnp.where(diag > 0, 0.0, 1.0))     # add *remaining* self loops
    deg = jnp.sum(A, axis=1)
    dinv = jnp.where(deg > 0, 1.0 / jnp.sqrt(deg), 0.0)
    return dinv[:, None] * A * dinv[None, :]


def gcn_forward(edge_index, x, params):
    w1, b1, w2, b2 = params
    n, _ = x.shape
    hdim = w1.shape[1]

    h_pad = _round_up(max(hdim, 1), LANE)

    # ---- Â row-tile size from a VMEM budget (3 Â buffers + XW1 ≤ ~40 MiB: fits the
    #      64 MiB physical VMEM of v7x with headroom; v5e/v6e have 128 MiB) ----
    n_min = _round_up(n, LANE)
    budget = 40 << 20
    tm = 512
    while tm > LANE and 3 * tm * n_min * 2 + 2 * n_min * h_pad * 2 > budget:
        tm //= 2
    tm = min(tm, n_min)                       # multiple of 128, >= 128
    n_pad = _round_up(n, tm)
    # TODO(synk): graphs where even a (128, n_pad) tile exceeds the budget need a K
    #             grid axis over the Â contraction with a per-row-tile h accumulator.

    # ---- dense Â (plain-JAX glue, O(N^2)) ----
    a_hat = normalized_adjacency(edge_index, n)
    a_hat_p = _pad2(a_hat, n_pad, n_pad).astype(jnp.bfloat16)    # [n_pad, n_pad]
    a0_p = _pad2(a_hat[0:1, :], 1, n_pad).astype(jnp.float32)    # row 0, kept in f32

    # ---- skip Â row tiles with zero layer-2 weight: forward() only needs node 0,
    #      so only tiles holding in-neighbours of node 0 (plus node 0 itself, via the
    #      gcn_norm self loop) contribute to the output ----
    ei = np.asarray(jax.device_get(edge_index))
    nbrs = set(ei[0][ei[1] == 0].tolist()) | {0}
    tiles = np.array(sorted({int(v) // tm for v in nbrs}), dtype=np.int32)
    if tiles.size == 0:
        tiles = np.zeros((1,), np.int32)
    n_steps = int(tiles.size)
    tiles_dev = jnp.asarray(tiles)
    a_bufs = 3 if n_steps >= 3 else 2          # deeper buffering on the one HBM stream

    # ---- X @ W1 hoisted out of the kernel (one small GEMM; XLA handles it) ----
    xw1 = x.astype(jnp.float32) @ w1.astype(jnp.float32)
    xw1_p = _pad2(xw1, n_pad, h_pad).astype(jnp.bfloat16)
    b1_p = _pad2(b1.reshape(1, -1), 1, h_pad).astype(jnp.float32)

    # Explicit VMEM limit sized to the real footprint (XW1 counted double-buffered in
    # case the single-buffer hint is unavailable); v5e default scoped VMEM is 16 MiB.
    vmem_bytes = (a_bufs * tm * (n_pad * 2 + 4)     # Â row tiles (bf16) + a0 tiles (f32)
                  + 2 * n_pad * h_pad * 2           # resident XW1 (bf16)
                  + 4 * h_pad * 4)                  # b1 + accumulator output (f32)
    vmem_limit = int(min(56 << 20, max(16 << 20, int(vmem_bytes * 1.5))))

    def _spec(shape, index_map, bufs):
        if bufs is None:
            return pl.BlockSpec(shape, index_map)
        return pl.BlockSpec(shape, index_map, pipeline_mode=pl.Buffered(bufs))

    def _build(use_buffered):
        stream = a_bufs if use_buffered else None
        const = 1 if use_buffered else None
        return pl.pallas_call(
            gcn_kernel,
            out_shape=jax.ShapeDtypeStruct((1, h_pad), jnp.float32),
            grid_spec=pltpu.PrefetchScalarGridSpec(
                num_scalar_prefetch=1,
                grid=(n_steps,),
                in_specs=[
                    _spec((tm, n_pad), lambda i, t: (t[i], 0), stream),   # Â row tile
                    _spec((1, tm), lambda i, t: (0, t[i]), stream),       # Â[0, tile]
                    _spec((n_pad, h_pad), lambda i, t: (0, 0), const),    # X @ W1
                    _spec((1, h_pad), lambda i, t: (0, 0), const),        # b1
                ],
                out_specs=pl.BlockSpec((1, h_pad), lambda i, t: (0, 0)),  # node-0 acc
            ),
            compiler_params=pltpu.CompilerParams(
                # Single axis is a reduction into the node-0 accumulator.
                # TODO(synk): on v7x (2 TCs) a 'parallel' axis emitting per-tile partial
                #             accumulators would use both cores; after tile skipping the
                #             visited-tile count is tiny, so this stays serial.
                dimension_semantics=("arbitrary",),
                vmem_limit_bytes=vmem_limit,
            ),
        )

    args = (tiles_dev, a_hat_p, a0_p, xw1_p, b1_p)
    try:
        acc = _build(True)(*args)
    except Exception:
        # Fallback for jax builds without BlockSpec.pipeline_mode / pl.Buffered support.
        acc = _build(False)(*args)

    # ---- tiny finalize in XLA: z0 = acc @ W2 + b2 ; log_softmax over real classes ----
    z = acc[:, :hdim] @ w2.astype(jnp.float32) + b2.reshape(1, -1).astype(jnp.float32)
    return jax.nn.log_softmax(z, axis=1)[0]


def init_params(key, num_node_features, num_classes, hidden=16):
    k1, k2 = jax.random.split(key)
    # Glorot-style init (GCNConv: glorot weights, zero bias)
    s1 = jnp.sqrt(6.0 / (num_node_features + hidden))
    s2 = jnp.sqrt(6.0 / (hidden + num_classes))
    w1 = jax.random.uniform(k1, (num_node_features, hidden), jnp.float32, -s1, s1)
    w2 = jax.random.uniform(k2, (hidden, num_classes), jnp.float32, -s2, s2)
    b1 = jnp.zeros((1, hidden), jnp.float32)
    b2 = jnp.zeros((1, num_classes), jnp.float32)
    return w1, b1, w2, b2


if __name__ == "__main__":
    key = jax.random.PRNGKey(0)
    kx, kp = jax.random.split(key)

    N = 16                  # number of graph nodes
    F_IN = 8                # num_node_features
    C = 4                   # num_classes

    # Deterministic node features
    x = jax.random.normal(kx, (N, F_IN), dtype=jnp.float32)

    # Deterministic bidirectional ring graph, edge_index shape [2, 2N]
    idx = jnp.arange(N, dtype=jnp.int32)
    nxt = (idx + 1) % N
    src = jnp.concatenate([idx, nxt])
    dst = jnp.concatenate([nxt, idx])
    edge_index = jnp.stack([src, dst])   # [2, 32]

    params = init_params(kp, F_IN, C)

    out = gcn_forward(edge_index, x, params)
    out = jax.block_until_ready(out)
    assert out.shape == (C,)

    # Pure-JAX f32 reference for sanity (bf16 operands -> loose tolerance)
    w1, b1, w2, b2 = params
    a_ref_mat = normalized_adjacency(edge_index, N)
    h1 = jnp.maximum(a_ref_mat @ (x @ w1) + b1, 0.0)
    z = a_ref_mat @ (h1 @ w2) + b2
    ref = jax.nn.log_softmax(z, axis=1)[0]
    assert jnp.allclose(out, ref, atol=5e-2, rtol=5e-2), (out, ref)

    print("KERNEL_OK")
</pallas_src>

<mosaic_0001>
module attributes {stable_mosaic.version = 11 : i64} {
  func.func @gcn_kernel(%arg0: i32, %arg1: memref<1xi32, #tpu.memory_space<smem>>, %arg2: memref<128x128xbf16, #tpu.memory_space<vmem>>, %arg3: memref<1x128xf32, #tpu.memory_space<vmem>>, %arg4: memref<128x128xbf16, #tpu.memory_space<vmem>>, %arg5: memref<1x128xf32, #tpu.memory_space<vmem>>, %arg6: memref<1x128xf32, #tpu.memory_space<vmem>>) attributes {dimension_semantics = [#tpu.dimension_semantics<arbitrary>], iteration_bounds = array<i64: 1>, scalar_prefetch = 1 : i64, scratch_operands = 0 : i64, tpu.core_type = #tpu.core_type<tc>, window_params = [{pipeline_mode = #tpu.pipeline_mode<double_buffered>, transform_indices = @transform_0, window_bounds = array<i64: 128, 128>}, {pipeline_mode = #tpu.pipeline_mode<double_buffered>, transform_indices = @transform_1, window_bounds = array<i64: 1, 128>}, {pipeline_mode = #tpu.pipeline_mode<synchronous>, transform_indices = @transform_2, window_bounds = array<i64: 128, 128>}, {pipeline_mode = #tpu.pipeline_mode<synchronous>, transform_indices = @transform_3, window_bounds = array<i64: 1, 128>}, {pipeline_mode = #tpu.pipeline_mode<synchronous>, transform_indices = @transform_4, window_bounds = array<i64: 1, 128>}]} {
    %c0_i32 = arith.constant 0 : i32
    %0 = arith.cmpi eq, %arg0, %c0_i32 : i32
    %1 = arith.extui %0 : i1 to i32
    %c0_i32_0 = arith.constant 0 : i32
    %2 = arith.cmpi ne, %1, %c0_i32_0 : i32
    scf.if %2 {
      %cst_14 = arith.constant 0.000000e+00 : f32
      %16 = vector.broadcast %cst_14 : f32 to vector<1x128xf32>
      %c0_15 = arith.constant 0 : index
      %c0_16 = arith.constant 0 : index
      %17 = vector.load %arg6[%c0_15, %c0_16] : memref<1x128xf32, #tpu.memory_space<vmem>>, vector<1x128xf32>
      tpu.vector_store %arg6[%c0_15, %c0_16], %16 {strides = array<i32>} : memref<1x128xf32, #tpu.memory_space<vmem>>, vector<1x128xf32>,
    } else {
    }
    %c0 = arith.constant 0 : index
    %c0_1 = arith.constant 0 : index
    %3 = vector.load %arg2[%c0, %c0_1] : memref<128x128xbf16, #tpu.memory_space<vmem>>, vector<128x128xbf16>
    %c0_2 = arith.constant 0 : index
    %c0_3 = arith.constant 0 : index
    %4 = vector.load %arg4[%c0_2, %c0_3] : memref<128x128xbf16, #tpu.memory_space<vmem>>, vector<128x128xbf16>
    %cst = arith.constant dense<0.000000e+00> : vector<128x128xf32>
    %5 = tpu.matmul %3, %4, %cst {dimension_numbers = #tpu.dot_dimension_numbers<[1], [0], [0], [1], [0, 0, 1, 1], [], []>} : vector<128x128xbf16>, vector<128x128xbf16>, vector<128x128xf32> -> vector<128x128xf32>
    %c0_4 = arith.constant 0 : index
    %c0_5 = arith.constant 0 : index
    %6 = vector.load %arg5[%c0_4, %c0_5] : memref<1x128xf32, #tpu.memory_space<vmem>>, vector<1x128xf32>
    %7 = vector.broadcast %6 : vector<1x128xf32> to vector<128x128xf32>
    %8 = arith.addf %5, %7 : vector<128x128xf32>
    %cst_6 = arith.constant 0.000000e+00 : f32
    %9 = vector.broadcast %cst_6 : f32 to vector<128x128xf32>
    %10 = arith.maximumf %8, %9 : vector<128x128xf32>
    %c0_7 = arith.constant 0 : index
    %c0_8 = arith.constant 0 : index
    %11 = vector.load %arg6[%c0_7, %c0_8] : memref<1x128xf32, #tpu.memory_space<vmem>>, vector<1x128xf32>
    %c0_9 = arith.constant 0 : index
    %c0_10 = arith.constant 0 : index
    %12 = vector.load %arg3[%c0_9, %c0_10] : memref<1x128xf32, #tpu.memory_space<vmem>>, vector<1x128xf32>
    %cst_11 = arith.constant dense<0.000000e+00> : vector<1x128xf32>
    %13 = tpu.matmul %12, %10, %cst_11 {dimension_numbers = #tpu.dot_dimension_numbers<[1], [0], [0], [1], [0, 0, 1, 1], [], []>} : vector<1x128xf32>, vector<128x128xf32>, vector<1x128xf32> -> vector<1x128xf32>
    %14 = arith.addf %11, %13 : vector<1x128xf32>
    %c0_12 = arith.constant 0 : index
    %c0_13 = arith.constant 0 : index
    %15 = vector.load %arg6[%c0_12, %c0_13] : memref<1x128xf32, #tpu.memory_space<vmem>>, vector<1x128xf32>
    tpu.vector_store %arg6[%c0_12, %c0_13], %14 {strides = array<i32>} : memref<1x128xf32, #tpu.memory_space<vmem>>, vector<1x128xf32>,
    return
  }
  func.func @transform_0(%arg0: i32, %arg1: memref<1xi32, #tpu.memory_space<smem>>) -> (i32, i32) {
    %0 = arith.index_cast %arg0 : i32 to index
    %1 = memref.load %arg1[%0] : memref<1xi32, #tpu.memory_space<smem>>
    %c0_i32 = arith.constant 0 : i32
    %c0_i32_0 = arith.constant 0 : i32
    return %1, %c0_i32 : i32, i32
  }
  func.func @transform_1(%arg0: i32, %arg1: memref<1xi32, #tpu.memory_space<smem>>) -> (i32, i32) {
    %0 = arith.index_cast %arg0 : i32 to index
    %1 = memref.load %arg1[%0] : memref<1xi32, #tpu.memory_space<smem>>
    %c0_i32 = arith.constant 0 : i32
    %c0_i32_0 = arith.constant 0 : i32
    return %c0_i32, %1 : i32, i32
  }
  func.func @transform_2(%arg0: i32, %arg1: memref<1xi32, #tpu.memory_space<smem>>) -> (i32, i32) {
    %c0_i32 = arith.constant 0 : i32
    %c0_i32_0 = arith.constant 0 : i32
    %c0_i32_1 = arith.constant 0 : i32
    return %c0_i32, %c0_i32_0 : i32, i32
  }
  func.func @transform_3(%arg0: i32, %arg1: memref<1xi32, #tpu.memory_space<smem>>) -> (i32, i32) {
    %c0_i32 = arith.constant 0 : i32
    %c0_i32_0 = arith.constant 0 : i32
    %c0_i32_1 = arith.constant 0 : i32
    return %c0_i32, %c0_i32_0 : i32, i32
  }
  func.func @transform_4(%arg0: i32, %arg1: memref<1xi32, #tpu.memory_space<smem>>) -> (i32, i32) {
    %c0_i32 = arith.constant 0 : i32
    %c0_i32_0 = arith.constant 0 : i32
    %c0_i32_1 = arith.constant 0 : i32
    return %c0_i32, %c0_i32_0 : i32, i32
  }
}

module attributes {stable_mosaic.version = 11 : i64} {
  func.func @gcn_kernel(%arg0: i32, %arg1: memref<1xi32, #tpu.memory_space<smem>>, %arg2: memref<128x128xbf16, #tpu.memory_space<vmem>>, %arg3: memref<1x128xf32, #tpu.memory_space<vmem>>, %arg4: memref<128x128xbf16, #tpu.memory_space<vmem>>, %arg5: memref<1x128xf32, #tpu.memory_space<vmem>>, %arg6: memref<1x128xf32, #tpu.memory_space<vmem>>) attributes {dimension_semantics = [#tpu.dimension_semantics<arbitrary>], iteration_bounds = array<i64: 1>, scalar_prefetch = 1 : i64, scratch_operands = 0 : i64, tpu.core_type = #tpu.core_type<tc>, window_params = [{transform_indices = @transform_0, window_bounds = array<i64: 128, 128>}, {transform_indices = @transform_1, window_bounds = array<i64: 1, 128>}, {pipeline_mode = #tpu.pipeline_mode<synchronous>, transform_indices = @transform_2, window_bounds = array<i64: 128, 128>}, {pipeline_mode = #tpu.pipeline_mode<synchronous>, transform_indices = @transform_3, window_bounds = array<i64: 1, 128>}, {pipeline_mode = #tpu.pipeline_mode<synchronous>, transform_indices = @transform_4, window_bounds = array<i64: 1, 128>}]} {
    %c0_i32 = arith.constant 0 : i32
    %0 = arith.cmpi eq, %arg0, %c0_i32 : i32
    %1 = arith.extui %0 : i1 to i32
    %c0_i32_0 = arith.constant 0 : i32
    %2 = arith.cmpi ne, %1, %c0_i32_0 : i32
    scf.if %2 {
      %cst_14 = arith.constant 0.000000e+00 : f32
      %16 = vector.broadcast %cst_14 : f32 to vector<1x128xf32>
      %c0_15 = arith.constant 0 : index
      %c0_16 = arith.constant 0 : index
      %17 = vector.load %arg6[%c0_15, %c0_16] : memref<1x128xf32, #tpu.memory_space<vmem>>, vector<1x128xf32>
      tpu.vector_store %arg6[%c0_15, %c0_16], %16 {strides = array<i32>} : memref<1x128xf32, #tpu.memory_space<vmem>>, vector<1x128xf32>,
    } else {
    }
    %c0 = arith.constant 0 : index
    %c0_1 = arith.constant 0 : index
    %3 = vector.load %arg2[%c0, %c0_1] : memref<128x128xbf16, #tpu.memory_space<vmem>>, vector<128x128xbf16>
    %c0_2 = arith.constant 0 : index
    %c0_3 = arith.constant 0 : index
    %4 = vector.load %arg4[%c0_2, %c0_3] : memref<128x128xbf16, #tpu.memory_space<vmem>>, vector<128x128xbf16>
    %cst = arith.constant dense<0.000000e+00> : vector<128x128xf32>
    %5 = tpu.matmul %3, %4, %cst {dimension_numbers = #tpu.dot_dimension_numbers<[1], [0], [0], [1], [0, 0, 1, 1], [], []>} : vector<128x128xbf16>, vector<128x128xbf16>, vector<128x128xf32> -> vector<128x128xf32>
    %c0_4 = arith.constant 0 : index
    %c0_5 = arith.constant 0 : index
    %6 = vector.load %arg5[%c0_4, %c0_5] : memref<1x128xf32, #tpu.memory_space<vmem>>, vector<1x128xf32>
    %7 = vector.broadcast %6 : vector<1x128xf32> to vector<128x128xf32>
    %8 = arith.addf %5, %7 : vector<128x128xf32>
    %cst_6 = arith.constant 0.000000e+00 : f32
    %9 = vector.broadcast %cst_6 : f32 to vector<128x128xf32>
    %10 = arith.maximumf %8, %9 : vector<128x128xf32>
    %c0_7 = arith.constant 0 : index
    %c0_8 = arith.constant 0 : index
    %11 = vector.load %arg6[%c0_7, %c0_8] : memref<1x128xf32, #tpu.memory_space<vmem>>, vector<1x128xf32>
    %c0_9 = arith.constant 0 : index
    %c0_10 = arith.constant 0 : index
    %12 = vector.load %arg3[%c0_9, %c0_10] : memref<1x128xf32, #tpu.memory_space<vmem>>, vector<1x128xf32>
    %cst_11 = arith.constant dense<0.000000e+00> : vector<1x128xf32>
    %13 = tpu.matmul %12, %10, %cst_11 {dimension_numbers = #tpu.dot_dimension_numbers<[1], [0], [0], [1], [0, 0, 1, 1], [], []>} : vector<1x128xf32>, vector<128x128xf32>, vector<1x128xf32> -> vector<1x128xf32>
    %14 = arith.addf %11, %13 : vector<1x128xf32>
    %c0_12 = arith.constant 0 : index
    %c0_13 = arith.constant 0 : index
    %15 = vector.load %arg6[%c0_12, %c0_13] : memref<1x128xf32, #tpu.memory_space<vmem>>, vector<1x128xf32>
    tpu.vector_store %arg6[%c0_12, %c0_13], %14 {strides = array<i32>} : memref<1x128xf32, #tpu.memory_space<vmem>>, vector<1x128xf32>,
    return
  }
  func.func @transform_0(%arg0: i32, %arg1: memref<1xi32, #tpu.memory_space<smem>>) -> (i32, i32) {
    %0 = arith.index_cast %arg0 : i32 to index
    %1 = memref.load %arg1[%0] : memref<1xi32, #tpu.memory_space<smem>>
    %c0_i32 = arith.constant 0 : i32
    %c0_i32_0 = arith.constant 0 : i32
    return %1, %c0_i32 : i32, i32
  }
  func.func @transform_1(%arg0: i32, %arg1: memref<1xi32, #tpu.memory_space<smem>>) -> (i32, i32) {
    %0 = arith.index_cast %arg0 : i32 to index
    %1 = memref.load %arg1[%0] : memref<1xi32, #tpu.memory_space<smem>>
    %c0_i32 = arith.constant 0 : i32
    %c0_i32_0 = arith.constant 0 : i32
    return %c0_i32, %1 : i32, i32
  }
  func.func @transform_2(%arg0: i32, %arg1: memref<1xi32, #tpu.memory_space<smem>>) -> (i32, i32) {
    %c0_i32 = arith.constant 0 : i32
    %c0_i32_0 = arith.constant 0 : i32
    %c0_i32_1 = arith.constant 0 : i32
    return %c0_i32, %c0_i32_0 : i32, i32
  }
  func.func @transform_3(%arg0: i32, %arg1: memref<1xi32, #tpu.memory_space<smem>>) -> (i32, i32) {
    %c0_i32 = arith.constant 0 : i32
    %c0_i32_0 = arith.constant 0 : i32
    %c0_i32_1 = arith.constant 0 : i32
    return %c0_i32, %c0_i32_0 : i32, i32
  }
  func.func @transform_4(%arg0: i32, %arg1: memref<1xi32, #tpu.memory_space<smem>>) -> (i32, i32) {
    %c0_i32 = arith.constant 0 : i32
    %c0_i32_0 = arith.constant 0 : i32
    %c0_i32_1 = arith.constant 0 : i32
    return %c0_i32, %c0_i32_0 : i32, i32
  }
}

</mosaic_0001>

<bundles_post_ra>
// kernel: tpu_custom_call.1
= control target key start
LH: loop header
LB: loop body
LE: loop exit
PB: predicated region body
PF: predicated region fallthrough
CT: control target
= control target key end

     0   :  { %11 = vsyncpa [#allocation5], 0  ;;  %s579_s0 = inlined_call_operand.<no memory space> [shape: s32[1], index: 0, kind: input, shape index: {}]   ;;  %s580_s1 = inlined_call_operand.hbm [shape: bf16[128,128], index: 1, kind: input, shape index: {}]   ;;  %s581_s2 = inlined_call_operand.vmem [shape: f32[1,128], index: 2, kind: input, shape index: {}]   ;;  %s582_s3 = inlined_call_operand.hbm [shape: bf16[128,128], index: 3, kind: input, shape index: {}]   ;;  %s583_s4 = inlined_call_operand.vmem [shape: f32[1,128], index: 4, kind: input, shape index: {}]   ;;  %s584_s5 = inlined_call_operand.hbm [shape: f32[1,128], index: 5, kind: output, shape index: {}]  }
   0x1   :  { %12 = vsyncpa [#allocation8], 0 }
   0x2   :  { %13 = vsyncpa [#allocation6], 0  ;;  %s387_s20 = sshll.u32 %s579_s0, 6  ;;  %s513_s24 = smov [#allocation4]  }
   0x3   :  { %s21_s23 = scalar_lea.hbm %s580_s1, %s387_s20  ;;  %s24_s25 = sshll.u32 %s513_s24, 4  ;;  %s25_s25 = int_to_ptr.vmem [resolvable:$true] %s24_s25 }
   0x4   :  { %s22_s26 = sshll.u32 %s21_s23, 4  ;;  %s42_s29 = sshll.u32 %s582_s3, 4  ;;  %s23_s26 = int_to_ptr.hbm [resolvable:$true] %s22_s26  ;;  %s43_s29 = int_to_ptr.hbm [resolvable:$true] %s42_s29 }
   0x5   :  { %s435_s30 = sshra.s32 %s23_s26, 4  ;;  %s439_s9 = scalar_lea.hbm %s580_s1, 64  ;;  %s436_s30 = int_to_ptr.hbm [resolvable:$true] %s435_s30 }
   0x6   :  { %s437_s6 = scalar_lea.hbm %s436_s30, 64  ;;  %p440_p1 = scmp.lt.s32.totalorder %s436_s30, %s580_s1 }
   0x7   :  { %p438_p0 = scmp.ne.s32.totalorder %s436_s30, %s437_s6  ;;  %p441_p2 = scmp.lt.s32.totalorder %s439_s9, %s437_s6 }
   0x9   :  { %p442_p3 = por %p441_p2, %p440_p1 }
   0xb   :  { %p443_p4 = pnand %p442_p3, %p438_p0 }
   0xd   :  { %446 = shalt.err (!%p443_p4)
}
   0xe   :  { %s514_s12 = smov 64   ;;  %s515_s13 = smov 4  }
   0xf   :  { %30 = dma.hbm_to_vmem [thread:$0]  %s23_s26, 1024, %s25_s25, [#allocation5], %s514_s12, %s514_s12, %s515_s13  }
  0x10   :  { %s516_s3 = smov [#allocation7]  }
  0x11   :  { %s44_s14 = sshll.u32 %s516_s3, 4  ;;  %s45_s14 = int_to_ptr.vmem [resolvable:$true] %s44_s14 }
  0x12   :  { %50 = dma.hbm_to_vmem [thread:$0]  %s43_s29, 1024, %s45_s14, [#allocation8], %s514_s12, %s514_s12, %s515_s13  }
  0x13   :  { %507 = dma.done.wait [#allocation5], 1024  }
  0x14   :  { %508 = vsyncadd [#allocation5], 4294966272 }
  0x15   :  { %509 = dma.done.wait [#allocation8], 1024  }
  0x16   :  { %510 = vsyncadd [#allocation8], 4294966272  ;;  %v403_v0 = vld [vmem:[#allocation7 + $0x38] sm:$0xff]  ;;  %v402_v1 = vld [vmem:[#allocation7 + $0x30] sm:$0xff]  ;;  %v517_v35 = vmov 0.0   ;;  %p68_p5 = scmp.lt.s32.totalorder %s579_s0, 0 }
  0x17   :  { %406 = vmatpush.bf16.msra.mxu3 %v403_v0  ;;  %404 = vmatpush.bf16.msra.mxu1 %v403_v0  ;;  %v401_v2 = vld [vmem:[#allocation7 + $0x28] sm:$0xff]  ;;  %v400_v3 = vld [vmem:[#allocation7 + $0x20] sm:$0xff]  ;;  %v399_v4 = vld [vmem:[#allocation7 + $0x18] sm:$0xff]  ;;  %76 = vst [vmem:[#allocation9] sm:$0x1] %v517_v35  ;;  %s518_s22 = smov [#allocation9]  }
  0x18   :  { %405 = vmatpush.bf16.msra.mxu2 %v403_v0  ;;  %209 = vmatpush.bf16.msra.mxu0 %v403_v0  ;;  %v398_v5 = vld [vmem:[#allocation7 + $0x10] sm:$0xff]  ;;  %v397_v6 = vld [vmem:[#allocation7 + $0x8] sm:$0xff]  ;;  %v396_v7 = vld [vmem:[#allocation7] sm:$0xff]  ;;  %s586_s0 = smov (!%p68_p5, %s579_s0), 0  ;;  %s303_s23 = sshll.u32 %s518_s22, 4  ;;  %s304_s23 = int_to_ptr.vmem [resolvable:$true] %s303_s23 }
  0x19   :  { %v393_v8 = vld [vmem:[#allocation4 + $0x28] sm:$0xff]  ;;  %v390_v9 = vld [vmem:[#allocation4 + $0x10] sm:$0xff]  ;;  %v392_v10 = vld [vmem:[#allocation4 + $0x20] sm:$0xff]  ;;  %s70_s21 = scalar_lea.vmem %s581_s2, %s586_s0  ;;  %s305_s26 = sshll.u32 %s584_s5, 4  ;;  %s306_s26 = int_to_ptr.hbm [resolvable:$true] %s305_s26 }
  0x1a   :  { %v388_v11 = vld [vmem:[#allocation4] sm:$0xff]  ;;  %v394_v12 = vld [vmem:[#allocation4 + $0x30] sm:$0xff]  ;;  %v391_v13 = vld [vmem:[#allocation4 + $0x18] sm:$0xff] }
  0x1b   :  { %409 = vmatpush.bf16.msra.mxu3 %v402_v1  ;;  %407 = vmatpush.bf16.msra.mxu1 %v402_v1  ;;  %v389_v14 = vld [vmem:[#allocation4 + $0x8] sm:$0xff]  ;;  %v395_v15 = vld [vmem:[#allocation4 + $0x38] sm:$0xff]  ;;  %v434_v25 = vld [vmem:[%s583_s4] ss:$0 sm:$0xff] }
  0x1c   :  { %408 = vmatpush.bf16.msra.mxu2 %v402_v1  ;;  %210 = vmatpush.bf16.msra.mxu0 %v402_v1 }
  0x1f   :  { %412 = vmatpush.bf16.msra.mxu3 %v401_v2  ;;  %410 = vmatpush.bf16.msra.mxu1 %v401_v2 }
  0x20   :  { %411 = vmatpush.bf16.msra.mxu2 %v401_v2  ;;  %211 = vmatpush.bf16.msra.mxu0 %v401_v2  ;;  %v275_v2 = vld [vmem:[%s70_s21] sm:$0x1] }
  0x23   :  { %415 = vmatpush.bf16.msra.mxu3 %v400_v3  ;;  %413 = vmatpush.bf16.msra.mxu1 %v400_v3 }
  0x24   :  { %414 = vmatpush.bf16.msra.mxu2 %v400_v3  ;;  %212 = vmatpush.bf16.msra.mxu0 %v400_v3  ;;  %v274_v3 = vld [vmem:[#allocation9] sm:$0x1] }
  0x27   :  { %418 = vmatpush.bf16.msra.mxu3 %v399_v4  ;;  %416 = vmatpush.bf16.msra.mxu1 %v399_v4 }
  0x28   :  { %417 = vmatpush.bf16.msra.mxu2 %v399_v4  ;;  %213 = vmatpush.bf16.msra.mxu0 %v399_v4 }
  0x2b   :  { %421 = vmatpush.bf16.msra.mxu3 %v398_v5  ;;  %419 = vmatpush.bf16.msra.mxu1 %v398_v5 }
  0x2c   :  { %420 = vmatpush.bf16.msra.mxu2 %v398_v5  ;;  %214 = vmatpush.bf16.msra.mxu0 %v398_v5 }
  0x2f   :  { %424 = vmatpush.bf16.msra.mxu3 %v397_v6  ;;  %422 = vmatpush.bf16.msra.mxu1 %v397_v6 }
  0x30   :  { %423 = vmatpush.bf16.msra.mxu2 %v397_v6  ;;  %215 = vmatpush.bf16.msra.mxu0 %v397_v6 }
  0x33   :  { %427 = vmatpush.bf16.msra.mxu3 %v396_v7  ;;  %425 = vmatpush.bf16.msra.mxu1 %v396_v7 }
  0x34   :  { %426 = vmatpush.bf16.msra.mxu2 %v396_v7  ;;  %216 = vmatpush.bf16.msra.mxu0 %v396_v7 }
  0x36   :  { %242 = vmatmul.bf16.vlgmr.msra.gmra.mxu3 %v393_v8  ;;  %227 = vmatmul.bf16.vlgmr.msra.gmra.mxu1 %v390_v9 }
  0x37   :  { %237 = vmatmul.bf16.vlgmr.msra.gmra.mxu2 %v392_v10  ;;  %217 = vmatmul.bf16.vlgmr.msra.gmra.mxu0 %v388_v11 }
  0x46   :  { %247 = vmatmul.bf16.gmra.mxu3 %v394_v12  ;;  %232 = vmatmul.bf16.gmra.mxu1 %v391_v13 }
  0x47   :  { %222 = vmatmul.bf16.gmra.mxu0 %v389_v14 }
  0x56   :  { %252 = vmatmul.bf16.gmra.mxu3 %v395_v15 }
  0xb3   :  { %v228_v19 = vpop.f32.mrf.mxu1 }
  0xb4   :  { %v218_v21 = vpop.f32.mrf.mxu0  ;;  %v229_v54 = vadd.f32 %v434_v25, %v228_v19 }
  0xb5   :  { %v219_v62 = vadd.f32 %v434_v25, %v218_v21 }
  0xb6   :  { %v262_v58 = vmax.f32 %v229_v54, 0.0 }
  0xb7   :  { %v258_v1 = vmax.f32 %v219_v62, 0.0 }
  0xb9   :  { %v243_v16 = vpop.f32.mrf.mxu3 }
  0xba   :  { %v238_v24 = vpop.f32.mrf.mxu2  ;;  %v244_v39 = vadd.f32 %v434_v25, %v243_v16 }
  0xbb   :  { %v230_v22 = vpop.f32.mrf.mxu1  ;;  %v239_v46 = vadd.f32 %v434_v25, %v238_v24 }
  0xbc   :  { %v220_v26 = vpop.f32.mrf.mxu0  ;;  %v268_v45 = vmax.f32 %v244_v39, 0.0  ;;  %v231_v51 = vadd.f32 %v434_v25, %v230_v22 }
  0xbd   :  { %v266_v49 = vmax.f32 %v239_v46, 0.0  ;;  %v221_v60 = vadd.f32 %v434_v25, %v220_v26 }
  0xbe   :  { %v263_v56 = vmax.f32 %v231_v51, 0.0 }
  0xbf   :  { %v259_v0 = vmax.f32 %v221_v60, 0.0 }
  0xc1   :  { %v245_v17 = vpop.f32.mrf.mxu3 }
  0xc2   :  { %v246_v36 = vadd.f32 %v434_v25, %v245_v17  ;;  %v240_v38 = vpop.f32.mrf.mxu2 }
  0xc3   :  { %v233_v30 = vpop.f32.mrf.mxu1  ;;  %v241_v43 = vadd.f32 %v434_v25, %v240_v38 }
  0xc4   :  { %v223_v41 = vpop.f32.mrf.mxu0  ;;  %v269_v42 = vmax.f32 %v246_v36, 0.0  ;;  %v234_v50 = vadd.f32 %v434_v25, %v233_v30 }
  0xc5   :  { %v267_v47 = vmax.f32 %v241_v43, 0.0  ;;  %v224_v59 = vadd.f32 %v434_v25, %v223_v41 }
  0xc6   :  { %v264_v55 = vmax.f32 %v234_v50, 0.0 }
  0xc7   :  { %v260_v63 = vmax.f32 %v224_v59, 0.0 }
  0xc9   :  { %v248_v18 = vpop.f32.mrf.mxu3 }
  0xca   :  { %v249_v33 = vadd.f32 %v434_v25, %v248_v18 }
  0xcb   :  { %v235_v44 = vpop.f32.mrf.mxu1 }
  0xcc   :  { %v270_v40 = vmax.f32 %v249_v33, 0.0  ;;  %v236_v48 = vadd.f32 %v434_v25, %v235_v44  ;;  %v225_v53 = vpop.f32.mrf.mxu0 }
  0xcd   :  { %v226_v57 = vadd.f32 %v434_v25, %v225_v53 }
  0xce   :  { %v265_v52 = vmax.f32 %v236_v48, 0.0 }
  0xcf   :  { %v261_v61 = vmax.f32 %v226_v57, 0.0 }
  0xd1   :  { %v250_v20 = vpop.f32.mrf.mxu3 }
  0xd2   :  { %v251_v31 = vadd.f32 %v434_v25, %v250_v20 }
  0xd4   :  { %v271_v37 = vmax.f32 %v251_v31, 0.0 }
  0xd9   :  { %v253_v23 = vpop.f32.mrf.mxu3 }
  0xda   :  { %v254_v28 = vadd.f32 %v434_v25, %v253_v23 }
  0xdc   :  { %v272_v34 = vmax.f32 %v254_v28, 0.0 }
  0xe1   :  { %v255_v27 = vpop.f32.mrf.mxu3 }
  0xe2   :  { %v256_v29 = vadd.f32 %v434_v25, %v255_v27 }
  0xe4   :  { %v273_v32 = vmax.f32 %v256_v29, 0.0 }
  0xe6   :  { %276 = vmatpush.msrb.mxu1 %v273_v32 }
  0xe8   :  { %277 = vmatpush.msrb.mxu1 %v272_v34 }
  0xea   :  { %278 = vmatpush.msrb.mxu1 %v271_v37 }
  0xec   :  { %279 = vmatpush.msrb.mxu1 %v270_v40 }
  0xee   :  { %280 = vmatpush.msrb.mxu1 %v269_v42 }
  0xf0   :  { %281 = vmatpush.msrb.mxu1 %v268_v45 }
  0xf2   :  { %282 = vmatpush.msrb.mxu1 %v267_v47 }
  0xf4   :  { %283 = vmatpush.msrb.mxu1 %v266_v49 }
  0xf6   :  { %284 = vmatpush.msrb.mxu1 %v265_v52 }
  0xf8   :  { %285 = vmatpush.msrb.mxu1 %v264_v55 }
  0xfa   :  { %286 = vmatpush.msrb.mxu1 %v263_v56 }
  0xfc   :  { %287 = vmatpush.msrb.mxu1 %v262_v58 }
  0xfe   :  { %288 = vmatpush.msrb.mxu1 %v261_v61 }
 0x100   :  { %289 = vmatpush.msrb.mxu1 %v260_v63 }
 0x102   :  { %290 = vmatpush.msrb.mxu1 %v259_v0 }
 0x104   :  { %291 = vmatpush.msrb.mxu1 %v258_v1 }
 0x105   :  { %292 = vmatmul.f32.vlgmr.msrb.gmra.mxu1 %v275_v2 }
 0x182   :  { %v293_v4 = vpop.f32.mrf.mxu1 }
 0x183   :  { %v296_v5 = vadd.f32 %v293_v4, %v274_v3 }
 0x185   :  { %297 = vst [vmem:[#allocation9] sm:$0x1] %v296_v5 }
 0x186   :  { %308 = dma.vmem_to_hbm [thread:$0]  %s304_s23, 16, %s306_s26, [#allocation6]  }
 0x187   :  { %511 = dma.done.wait [#allocation6], 16  }
 0x188   :  { %512 = vsyncadd [#allocation6], 4294967280 }
 0x189   :  { %313 = vsyncpa [#allocation5], 1 }
 0x18a   :  { %314 = vsyncpa [#allocation8], 1 }
 0x18b   :  { %315 = vsyncpa [#allocation6], 1 }

// kernel: tpu_custom_call.1
= control target key start
LH: loop header
LB: loop body
LE: loop exit
PB: predicated region body
PF: predicated region fallthrough
CT: control target
= control target key end

     0   :  { %11 = vsyncpa [#allocation5], 0  ;;  %s579_s0 = inlined_call_operand.<no memory space> [shape: s32[1], index: 0, kind: input, shape index: {}]   ;;  %s580_s1 = inlined_call_operand.hbm [shape: bf16[128,128], index: 1, kind: input, shape index: {}]   ;;  %s581_s2 = inlined_call_operand.vmem [shape: f32[1,128], index: 2, kind: input, shape index: {}]   ;;  %s582_s3 = inlined_call_operand.hbm [shape: bf16[128,128], index: 3, kind: input, shape index: {}]   ;;  %s583_s4 = inlined_call_operand.vmem [shape: f32[1,128], index: 4, kind: input, shape index: {}]   ;;  %s584_s5 = inlined_call_operand.hbm [shape: f32[1,128], index: 5, kind: output, shape index: {}]  }
   0x1   :  { %12 = vsyncpa [#allocation8], 0 }
   0x2   :  { %13 = vsyncpa [#allocation6], 0  ;;  %s387_s20 = sshll.u32 %s579_s0, 6  ;;  %s513_s24 = smov [#allocation4]  }
   0x3   :  { %s21_s23 = scalar_lea.hbm %s580_s1, %s387_s20  ;;  %s24_s25 = sshll.u32 %s513_s24, 4  ;;  %s25_s25 = int_to_ptr.vmem [resolvable:$true] %s24_s25 }
   0x4   :  { %s22_s26 = sshll.u32 %s21_s23, 4  ;;  %s42_s29 = sshll.u32 %s582_s3, 4  ;;  %s23_s26 = int_to_ptr.hbm [resolvable:$true] %s22_s26  ;;  %s43_s29 = int_to_ptr.hbm [resolvable:$true] %s42_s29 }
   0x5   :  { %s435_s30 = sshra.s32 %s23_s26, 4  ;;  %s439_s9 = scalar_lea.hbm %s580_s1, 64  ;;  %s436_s30 = int_to_ptr.hbm [resolvable:$true] %s435_s30 }
   0x6   :  { %s437_s6 = scalar_lea.hbm %s436_s30, 64  ;;  %p440_p1 = scmp.lt.s32.totalorder %s436_s30, %s580_s1 }
   0x7   :  { %p438_p0 = scmp.ne.s32.totalorder %s436_s30, %s437_s6  ;;  %p441_p2 = scmp.lt.s32.totalorder %s439_s9, %s437_s6 }
   0x9   :  { %p442_p3 = por %p441_p2, %p440_p1 }
   0xb   :  { %p443_p4 = pnand %p442_p3, %p438_p0 }
   0xd   :  { %446 = shalt.err (!%p443_p4)
}
   0xe   :  { %s514_s12 = smov 64   ;;  %s515_s13 = smov 4  }
   0xf   :  { %30 = dma.hbm_to_vmem [thread:$0]  %s23_s26, 1024, %s25_s25, [#allocation5], %s514_s12, %s514_s12, %s515_s13  }
  0x10   :  { %s516_s3 = smov [#allocation7]  }
  0x11   :  { %s44_s14 = sshll.u32 %s516_s3, 4  ;;  %s45_s14 = int_to_ptr.vmem [resolvable:$true] %s44_s14 }
  0x12   :  { %50 = dma.hbm_to_vmem [thread:$0]  %s43_s29, 1024, %s45_s14, [#allocation8], %s514_s12, %s514_s12, %s515_s13  }
  0x13   :  { %507 = dma.done.wait [#allocation5], 1024  }
  0x14   :  { %508 = vsyncadd [#allocation5], 4294966272 }
  0x15   :  { %509 = dma.done.wait [#allocation8], 1024  }
  0x16   :  { %510 = vsyncadd [#allocation8], 4294966272  ;;  %v403_v0 = vld [vmem:[#allocation7 + $0x38] sm:$0xff]  ;;  %v402_v1 = vld [vmem:[#allocation7 + $0x30] sm:$0xff]  ;;  %v517_v35 = vmov 0.0   ;;  %p68_p5 = scmp.lt.s32.totalorder %s579_s0, 0 }
  0x17   :  { %406 = vmatpush.bf16.msra.mxu3 %v403_v0  ;;  %404 = vmatpush.bf16.msra.mxu1 %v403_v0  ;;  %v401_v2 = vld [vmem:[#allocation7 + $0x28] sm:$0xff]  ;;  %v400_v3 = vld [vmem:[#allocation7 + $0x20] sm:$0xff]  ;;  %v399_v4 = vld [vmem:[#allocation7 + $0x18] sm:$0xff]  ;;  %76 = vst [vmem:[#allocation9] sm:$0x1] %v517_v35  ;;  %s518_s22 = smov [#allocation9]  }
  0x18   :  { %405 = vmatpush.bf16.msra.mxu2 %v403_v0  ;;  %209 = vmatpush.bf16.msra.mxu0 %v403_v0  ;;  %v398_v5 = vld [vmem:[#allocation7 + $0x10] sm:$0xff]  ;;  %v397_v6 = vld [vmem:[#allocation7 + $0x8] sm:$0xff]  ;;  %v396_v7 = vld [vmem:[#allocation7] sm:$0xff]  ;;  %s586_s0 = smov (!%p68_p5, %s579_s0), 0  ;;  %s303_s23 = sshll.u32 %s518_s22, 4  ;;  %s304_s23 = int_to_ptr.vmem [resolvable:$true] %s303_s23 }
  0x19   :  { %v393_v8 = vld [vmem:[#allocation4 + $0x28] sm:$0xff]  ;;  %v390_v9 = vld [vmem:[#allocation4 + $0x10] sm:$0xff]  ;;  %v392_v10 = vld [vmem:[#allocation4 + $0x20] sm:$0xff]  ;;  %s70_s21 = scalar_lea.vmem %s581_s2, %s586_s0  ;;  %s305_s26 = sshll.u32 %s584_s5, 4  ;;  %s306_s26 = int_to_ptr.hbm [resolvable:$true] %s305_s26 }
  0x1a   :  { %v388_v11 = vld [vmem:[#allocation4] sm:$0xff]  ;;  %v394_v12 = vld [vmem:[#allocation4 + $0x30] sm:$0xff]  ;;  %v391_v13 = vld [vmem:[#allocation4 + $0x18] sm:$0xff] }
  0x1b   :  { %409 = vmatpush.bf16.msra.mxu3 %v402_v1  ;;  %407 = vmatpush.bf16.msra.mxu1 %v402_v1  ;;  %v389_v14 = vld [vmem:[#allocation4 + $0x8] sm:$0xff]  ;;  %v395_v15 = vld [vmem:[#allocation4 + $0x38] sm:$0xff]  ;;  %v434_v25 = vld [vmem:[%s583_s4] ss:$0 sm:$0xff] }
  0x1c   :  { %408 = vmatpush.bf16.msra.mxu2 %v402_v1  ;;  %210 = vmatpush.bf16.msra.mxu0 %v402_v1 }
  0x1f   :  { %412 = vmatpush.bf16.msra.mxu3 %v401_v2  ;;  %410 = vmatpush.bf16.msra.mxu1 %v401_v2 }
  0x20   :  { %411 = vmatpush.bf16.msra.mxu2 %v401_v2  ;;  %211 = vmatpush.bf16.msra.mxu0 %v401_v2  ;;  %v275_v2 = vld [vmem:[%s70_s21] sm:$0x1] }
  0x23   :  { %415 = vmatpush.bf16.msra.mxu3 %v400_v3  ;;  %413 = vmatpush.bf16.msra.mxu1 %v400_v3 }
  0x24   :  { %414 = vmatpush.bf16.msra.mxu2 %v400_v3  ;;  %212 = vmatpush.bf16.msra.mxu0 %v400_v3  ;;  %v274_v3 = vld [vmem:[#allocation9] sm:$0x1] }
  0x27   :  { %418 = vmatpush.bf16.msra.mxu3 %v399_v4  ;;  %416 = vmatpush.bf16.msra.mxu1 %v399_v4 }
  0x28   :  { %417 = vmatpush.bf16.msra.mxu2 %v399_v4  ;;  %213 = vmatpush.bf16.msra.mxu0 %v399_v4 }
  0x2b   :  { %421 = vmatpush.bf16.msra.mxu3 %v398_v5  ;;  %419 = vmatpush.bf16.msra.mxu1 %v398_v5 }
  0x2c   :  { %420 = vmatpush.bf16.msra.mxu2 %v398_v5  ;;  %214 = vmatpush.bf16.msra.mxu0 %v398_v5 }
  0x2f   :  { %424 = vmatpush.bf16.msra.mxu3 %v397_v6  ;;  %422 = vmatpush.bf16.msra.mxu1 %v397_v6 }
  0x30   :  { %423 = vmatpush.bf16.msra.mxu2 %v397_v6  ;;  %215 = vmatpush.bf16.msra.mxu0 %v397_v6 }
  0x33   :  { %427 = vmatpush.bf16.msra.mxu3 %v396_v7  ;;  %425 = vmatpush.bf16.msra.mxu1 %v396_v7 }
  0x34   :  { %426 = vmatpush.bf16.msra.mxu2 %v396_v7  ;;  %216 = vmatpush.bf16.msra.mxu0 %v396_v7 }
  0x36   :  { %242 = vmatmul.bf16.vlgmr.msra.gmra.mxu3 %v393_v8  ;;  %227 = vmatmul.bf16.vlgmr.msra.gmra.mxu1 %v390_v9 }
  0x37   :  { %237 = vmatmul.bf16.vlgmr.msra.gmra.mxu2 %v392_v10  ;;  %217 = vmatmul.bf16.vlgmr.msra.gmra.mxu0 %v388_v11 }
  0x46   :  { %247 = vmatmul.bf16.gmra.mxu3 %v394_v12  ;;  %232 = vmatmul.bf16.gmra.mxu1 %v391_v13 }
  0x47   :  { %222 = vmatmul.bf16.gmra.mxu0 %v389_v14 }
  0x56   :  { %252 = vmatmul.bf16.gmra.mxu3 %v395_v15 }
  0xb3   :  { %v228_v19 = vpop.f32.mrf.mxu1 }
  0xb4   :  { %v218_v21 = vpop.f32.mrf.mxu0  ;;  %v229_v54 = vadd.f32 %v434_v25, %v228_v19 }
  0xb5   :  { %v219_v62 = vadd.f32 %v434_v25, %v218_v21 }
  0xb6   :  { %v262_v58 = vmax.f32 %v229_v54, 0.0 }
  0xb7   :  { %v258_v1 = vmax.f32 %v219_v62, 0.0 }
  0xb9   :  { %v243_v16 = vpop.f32.mrf.mxu3 }
  0xba   :  { %v238_v24 = vpop.f32.mrf.mxu2  ;;  %v244_v39 = vadd.f32 %v434_v25, %v243_v16 }
  0xbb   :  { %v230_v22 = vpop.f32.mrf.mxu1  ;;  %v239_v46 = vadd.f32 %v434_v25, %v238_v24 }
  0xbc   :  { %v220_v26 = vpop.f32.mrf.mxu0  ;;  %v268_v45 = vmax.f32 %v244_v39, 0.0  ;;  %v231_v51 = vadd.f32 %v434_v25, %v230_v22 }
  0xbd   :  { %v266_v49 = vmax.f32 %v239_v46, 0.0  ;;  %v221_v60 = vadd.f32 %v434_v25, %v220_v26 }
  0xbe   :  { %v263_v56 = vmax.f32 %v231_v51, 0.0 }
  0xbf   :  { %v259_v0 = vmax.f32 %v221_v60, 0.0 }
  0xc1   :  { %v245_v17 = vpop.f32.mrf.mxu3 }
  0xc2   :  { %v246_v36 = vadd.f32 %v434_v25, %v245_v17  ;;  %v240_v38 = vpop.f32.mrf.mxu2 }
  0xc3   :  { %v233_v30 = vpop.f32.mrf.mxu1  ;;  %v241_v43 = vadd.f32 %v434_v25, %v240_v38 }
  0xc4   :  { %v223_v41 = vpop.f32.mrf.mxu0  ;;  %v269_v42 = vmax.f32 %v246_v36, 0.0  ;;  %v234_v50 = vadd.f32 %v434_v25, %v233_v30 }
  0xc5   :  { %v267_v47 = vmax.f32 %v241_v43, 0.0  ;;  %v224_v59 = vadd.f32 %v434_v25, %v223_v41 }
  0xc6   :  { %v264_v55 = vmax.f32 %v234_v50, 0.0 }
  0xc7   :  { %v260_v63 = vmax.f32 %v224_v59, 0.0 }
  0xc9   :  { %v248_v18 = vpop.f32.mrf.mxu3 }
  0xca   :  { %v249_v33 = vadd.f32 %v434_v25, %v248_v18 }
  0xcb   :  { %v235_v44 = vpop.f32.mrf.mxu1 }
  0xcc   :  { %v270_v40 = vmax.f32 %v249_v33, 0.0  ;;  %v236_v48 = vadd.f32 %v434_v25, %v235_v44  ;;  %v225_v53 = vpop.f32.mrf.mxu0 }
  0xcd   :  { %v226_v57 = vadd.f32 %v434_v25, %v225_v53 }
  0xce   :  { %v265_v52 = vmax.f32 %v236_v48, 0.0 }
  0xcf   :  { %v261_v61 = vmax.f32 %v226_v57, 0.0 }
  0xd1   :  { %v250_v20 = vpop.f32.mrf.mxu3 }
  0xd2   :  { %v251_v31 = vadd.f32 %v434_v25, %v250_v20 }
  0xd4   :  { %v271_v37 = vmax.f32 %v251_v31, 0.0 }
  0xd9   :  { %v253_v23 = vpop.f32.mrf.mxu3 }
  0xda   :  { %v254_v28 = vadd.f32 %v434_v25, %v253_v23 }
  0xdc   :  { %v272_v34 = vmax.f32 %v254_v28, 0.0 }
  0xe1   :  { %v255_v27 = vpop.f32.mrf.mxu3 }
  0xe2   :  { %v256_v29 = vadd.f32 %v434_v25, %v255_v27 }
  0xe4   :  { %v273_v32 = vmax.f32 %v256_v29, 0.0 }
  0xe6   :  { %276 = vmatpush.msrb.mxu1 %v273_v32 }
  0xe8   :  { %277 = vmatpush.msrb.mxu1 %v272_v34 }
  0xea   :  { %278 = vmatpush.msrb.mxu1 %v271_v37 }
  0xec   :  { %279 = vmatpush.msrb.mxu1 %v270_v40 }
  0xee   :  { %280 = vmatpush.msrb.mxu1 %v269_v42 }
  0xf0   :  { %281 = vmatpush.msrb.mxu1 %v268_v45 }
  0xf2   :  { %282 = vmatpush.msrb.mxu1 %v267_v47 }
  0xf4   :  { %283 = vmatpush.msrb.mxu1 %v266_v49 }
  0xf6   :  { %284 = vmatpush.msrb.mxu1 %v265_v52 }
  0xf8   :  { %285 = vmatpush.msrb.mxu1 %v264_v55 }
  0xfa   :  { %286 = vmatpush.msrb.mxu1 %v263_v56 }
  0xfc   :  { %287 = vmatpush.msrb.mxu1 %v262_v58 }
  0xfe   :  { %288 = vmatpush.msrb.mxu1 %v261_v61 }
 0x100   :  { %289 = vmatpush.msrb.mxu1 %v260_v63 }
 0x102   :  { %290 = vmatpush.msrb.mxu1 %v259_v0 }
 0x104   :  { %291 = vmatpush.msrb.mxu1 %v258_v1 }
 0x105   :  { %292 = vmatmul.f32.vlgmr.msrb.gmra.mxu1 %v275_v2 }
 0x182   :  { %v293_v4 = vpop.f32.mrf.mxu1 }
 0x183   :  { %v296_v5 = vadd.f32 %v293_v4, %v274_v3 }
 0x185   :  { %297 = vst [vmem:[#allocation9] sm:$0x1] %v296_v5 }
 0x186   :  { %308 = dma.vmem_to_hbm [thread:$0]  %s304_s23, 16, %s306_s26, [#allocation6]  }
 0x187   :  { %511 = dma.done.wait [#allocation6], 16  }
 0x188   :  { %512 = vsyncadd [#allocation6], 4294967280 }
 0x189   :  { %313 = vsyncpa [#allocation5], 1 }
 0x18a   :  { %314 = vsyncpa [#allocation8], 1 }
 0x18b   :  { %315 = vsyncpa [#allocation6], 1 }

</bundles_post_ra>
